<compile_context>
chip_gen: v6e
topology: v6e:2x2x1
jax: 0.10.0
libtpu: 0.0.40
codegen_flags: <defaults>
</compile_context>

<pallas_src>
import functools

import jax
import jax.numpy as jnp
from jax.experimental import pallas as pl
from jax.experimental.pallas import tpu as pltpu

# Layer dimensions of the PyTorch module (fc1..fc4, all bias-free).
_LAYER_DIMS = [(5, 3), (3, 5), (6, 3), (2, 6)]   # (out_features, in_features)
_IN_DIM = _LAYER_DIMS[0][1]                       # 3
_OUT_DIM = _LAYER_DIMS[-1][0]                     # 2

# Batch tile (lane) width per grid step. Multiple of 128; small data per step,
# so VMEM is never a concern (fits easily in v7x's 32 MiB scoped default).
_DEFAULT_TB = 512


def _vpu_layer(wmat, h, *, relu):
    """h_out = wmat @ h via unrolled broadcast FMAs on the VPU.

    wmat: (out_f, in_f) small weight matrix (a value, already in VMEM/vregs)
    h:    (in_f, TB)    activations, batch on the lane axis
    """
    in_f = wmat.shape[1]
    acc = wmat[:, 0:1] * h[0:1, :]                  # (out_f, 1) * (1, TB)
    for k in range(1, in_f):                        # static unroll, 2..5 FMAs
        acc = acc + wmat[:, k:k+1] * h[k:k+1, :]
    return jnp.maximum(acc, 0.0) if relu else acc


def _mlp_kernel(x_ref, w_ref, o_ref):
    # x_ref: (3, TB)  transposed input tile (batch on lanes)
    # w_ref: (4, 8, 8) packed, zero-padded PyTorch [out, in] weights (resident)
    # o_ref: (2, TB)  transposed output tile (lane-dense store)
    xt = x_ref[...]
    w = w_ref[...]

    h = _vpu_layer(w[0, :5, :3], xt, relu=True)     # fc1 + relu -> (5, TB)
    h = _vpu_layer(w[1, :3, :5], h, relu=True)      # fc2 + relu -> (3, TB)
    h = _vpu_layer(w[2, :6, :3], h, relu=True)      # fc3 + relu -> (6, TB)
    h = _vpu_layer(w[3, :2, :6], h, relu=False)     # fc4        -> (2, TB)

    o_ref[...] = h                                   # already float32


def pack_weights(w1, w2, w3, w4):
    """Pack PyTorch-layout [out, in] weights into one (4, 8, 8) zero-padded
    buffer. Call once at init (hoisted out of the per-forward path)."""
    wp = jnp.zeros((4, 8, 8), jnp.float32)
    wp = wp.at[0, :5, :3].set(w1)
    wp = wp.at[1, :3, :5].set(w2)
    wp = wp.at[2, :6, :3].set(w3)
    wp = wp.at[3, :2, :6].set(w4)
    return wp


@functools.partial(jax.jit, static_argnames=("tb",))
def simplenet_forward(x, w_packed, *, tb=_DEFAULT_TB):
    """x: [B, 3] float32; w_packed: (4, 8, 8) from pack_weights(). -> [B, 2]"""
    B = x.shape[0]
    n_blocks = pl.cdiv(B, tb)
    B_pad = n_blocks * tb

    # One boundary transpose + pad so the kernel sees a lane-dense [3, B_pad].
    xt = jnp.pad(x.T, ((0, 0), (0, B_pad - B)))

    out_t = pl.pallas_call(
        _mlp_kernel,
        out_shape=jax.ShapeDtypeStruct((_OUT_DIM, B_pad), jnp.float32),
        grid=(n_blocks,),
        in_specs=[
            # Batch-tiled input, pipelined across grid steps.
            pl.BlockSpec((_IN_DIM, tb), lambda i: (0, i)),
            # Packed weights: constant index map -> fetched once, VMEM-resident.
            pl.BlockSpec((4, 8, 8), lambda i: (0, 0, 0)),
        ],
        out_specs=pl.BlockSpec((_OUT_DIM, tb), lambda i: (0, i)),
        compiler_params=pltpu.CompilerParams(
            dimension_semantics=("parallel",),   # megacore sharding on v7x
        ),
    )(xt, w_packed)

    return out_t[:, :B].T                            # back to [B, 2]


def _init_linear_weight(key, out_features, in_features):
    # Matches nn.Linear's U(-1/sqrt(in), 1/sqrt(in)) range (values synthetic).
    bound = 1.0 / jnp.sqrt(jnp.float32(in_features))
    return jax.random.uniform(
        key, (out_features, in_features), jnp.float32, minval=-bound, maxval=bound
    )


def reference_forward(x, w1, w2, w3, w4):
    h = jnp.maximum(x @ w1.T, 0.0)
    h = jnp.maximum(h @ w2.T, 0.0)
    h = jnp.maximum(h @ w3.T, 0.0)
    return h @ w4.T


if __name__ == "__main__":
    key = jax.random.PRNGKey(0)
    kx, k1, k2, k3, k4 = jax.random.split(key, 5)

    batch = 8
    x = jax.random.normal(kx, (batch, 3), jnp.float32)

    w1 = _init_linear_weight(k1, 5, 3)   # fc1: Linear(3, 5, bias=False)
    w2 = _init_linear_weight(k2, 3, 5)   # fc2: Linear(5, 3, bias=False)
    w3 = _init_linear_weight(k3, 6, 3)   # fc3: Linear(3, 6, bias=False)
    w4 = _init_linear_weight(k4, 2, 6)   # fc4: Linear(6, 2, bias=False)

    # Pack once at init (kernel-ready layout, hoisted out of the call path).
    w_packed = pack_weights(w1, w2, w3, w4)

    out = simplenet_forward(x, w_packed)
    jax.block_until_ready(out)

    ref = reference_forward(x, w1, w2, w3, w4)
    assert out.shape == (batch, 2)
    assert jnp.allclose(out, ref, atol=1e-5, rtol=1e-5), "mismatch vs reference"

    print("KERNEL_OK")
</pallas_src>

<mosaic_0001>
module attributes {stable_mosaic.version = 11 : i64} {
  func.func @_mlp_kernel(%arg0: i32, %arg1: memref<3x512xf32, #tpu.memory_space<vmem>>, %arg2: memref<4x8x8xf32, #tpu.memory_space<vmem>>, %arg3: memref<2x512xf32, #tpu.memory_space<vmem>>) attributes {dimension_semantics = [#tpu.dimension_semantics<parallel>], iteration_bounds = array<i64: 1>, scalar_prefetch = 0 : i64, scratch_operands = 0 : i64, tpu.core_type = #tpu.core_type<tc>, window_params = [{transform_indices = @transform_0, window_bounds = array<i64: 3, 512>}, {pipeline_mode = #tpu.pipeline_mode<synchronous>, transform_indices = @transform_1, window_bounds = array<i64: 4, 8, 8>}, {transform_indices = @transform_2, window_bounds = array<i64: 2, 512>}]} {
    %c0 = arith.constant 0 : index
    %c0_0 = arith.constant 0 : index
    %0 = vector.load %arg1[%c0, %c0_0] : memref<3x512xf32, #tpu.memory_space<vmem>>, vector<3x512xf32>
    %c0_1 = arith.constant 0 : index
    %c0_2 = arith.constant 0 : index
    %c0_3 = arith.constant 0 : index
    %1 = vector.load %arg2[%c0_1, %c0_2, %c0_3] : memref<4x8x8xf32, #tpu.memory_space<vmem>>, vector<4x8x8xf32>
    %2 = vector.extract_strided_slice %1 {offsets = [0, 0, 0], sizes = [1, 5, 3], strides = [1, 1, 1]} : vector<4x8x8xf32> to vector<1x5x3xf32>
    %3 = vector.shape_cast %2 : vector<1x5x3xf32> to vector<5x3xf32>
    %4 = vector.extract_strided_slice %3 {offsets = [0, 0], sizes = [5, 1], strides = [1, 1]} : vector<5x3xf32> to vector<5x1xf32>
    %5 = vector.extract_strided_slice %0 {offsets = [0, 0], sizes = [1, 512], strides = [1, 1]} : vector<3x512xf32> to vector<1x512xf32>
    %6 = vector.broadcast %4 : vector<5x1xf32> to vector<5x512xf32>
    %7 = vector.broadcast %5 : vector<1x512xf32> to vector<5x512xf32>
    %8 = arith.mulf %6, %7 : vector<5x512xf32>
    %9 = vector.extract_strided_slice %3 {offsets = [0, 1], sizes = [5, 1], strides = [1, 1]} : vector<5x3xf32> to vector<5x1xf32>
    %10 = vector.extract_strided_slice %0 {offsets = [1, 0], sizes = [1, 512], strides = [1, 1]} : vector<3x512xf32> to vector<1x512xf32>
    %11 = vector.broadcast %9 : vector<5x1xf32> to vector<5x512xf32>
    %12 = vector.broadcast %10 : vector<1x512xf32> to vector<5x512xf32>
    %13 = arith.mulf %11, %12 : vector<5x512xf32>
    %14 = arith.addf %8, %13 : vector<5x512xf32>
    %15 = vector.extract_strided_slice %3 {offsets = [0, 2], sizes = [5, 1], strides = [1, 1]} : vector<5x3xf32> to vector<5x1xf32>
    %16 = vector.extract_strided_slice %0 {offsets = [2, 0], sizes = [1, 512], strides = [1, 1]} : vector<3x512xf32> to vector<1x512xf32>
    %17 = vector.broadcast %15 : vector<5x1xf32> to vector<5x512xf32>
    %18 = vector.broadcast %16 : vector<1x512xf32> to vector<5x512xf32>
    %19 = arith.mulf %17, %18 : vector<5x512xf32>
    %20 = arith.addf %14, %19 : vector<5x512xf32>
    %cst = arith.constant 0.000000e+00 : f32
    %21 = vector.broadcast %cst : f32 to vector<5x512xf32>
    %22 = arith.maximumf %20, %21 : vector<5x512xf32>
    %23 = vector.extract_strided_slice %1 {offsets = [1, 0, 0], sizes = [1, 3, 5], strides = [1, 1, 1]} : vector<4x8x8xf32> to vector<1x3x5xf32>
    %24 = vector.shape_cast %23 : vector<1x3x5xf32> to vector<3x5xf32>
    %25 = vector.extract_strided_slice %24 {offsets = [0, 0], sizes = [3, 1], strides = [1, 1]} : vector<3x5xf32> to vector<3x1xf32>
    %26 = vector.extract_strided_slice %22 {offsets = [0, 0], sizes = [1, 512], strides = [1, 1]} : vector<5x512xf32> to vector<1x512xf32>
    %27 = vector.broadcast %25 : vector<3x1xf32> to vector<3x512xf32>
    %28 = vector.broadcast %26 : vector<1x512xf32> to vector<3x512xf32>
    %29 = arith.mulf %27, %28 : vector<3x512xf32>
    %30 = vector.extract_strided_slice %24 {offsets = [0, 1], sizes = [3, 1], strides = [1, 1]} : vector<3x5xf32> to vector<3x1xf32>
    %31 = vector.extract_strided_slice %22 {offsets = [1, 0], sizes = [1, 512], strides = [1, 1]} : vector<5x512xf32> to vector<1x512xf32>
    %32 = vector.broadcast %30 : vector<3x1xf32> to vector<3x512xf32>
    %33 = vector.broadcast %31 : vector<1x512xf32> to vector<3x512xf32>
    %34 = arith.mulf %32, %33 : vector<3x512xf32>
    %35 = arith.addf %29, %34 : vector<3x512xf32>
    %36 = vector.extract_strided_slice %24 {offsets = [0, 2], sizes = [3, 1], strides = [1, 1]} : vector<3x5xf32> to vector<3x1xf32>
    %37 = vector.extract_strided_slice %22 {offsets = [2, 0], sizes = [1, 512], strides = [1, 1]} : vector<5x512xf32> to vector<1x512xf32>
    %38 = vector.broadcast %36 : vector<3x1xf32> to vector<3x512xf32>
    %39 = vector.broadcast %37 : vector<1x512xf32> to vector<3x512xf32>
    %40 = arith.mulf %38, %39 : vector<3x512xf32>
    %41 = arith.addf %35, %40 : vector<3x512xf32>
    %42 = vector.extract_strided_slice %24 {offsets = [0, 3], sizes = [3, 1], strides = [1, 1]} : vector<3x5xf32> to vector<3x1xf32>
    %43 = vector.extract_strided_slice %22 {offsets = [3, 0], sizes = [1, 512], strides = [1, 1]} : vector<5x512xf32> to vector<1x512xf32>
    %44 = vector.broadcast %42 : vector<3x1xf32> to vector<3x512xf32>
    %45 = vector.broadcast %43 : vector<1x512xf32> to vector<3x512xf32>
    %46 = arith.mulf %44, %45 : vector<3x512xf32>
    %47 = arith.addf %41, %46 : vector<3x512xf32>
    %48 = vector.extract_strided_slice %24 {offsets = [0, 4], sizes = [3, 1], strides = [1, 1]} : vector<3x5xf32> to vector<3x1xf32>
    %49 = vector.extract_strided_slice %22 {offsets = [4, 0], sizes = [1, 512], strides = [1, 1]} : vector<5x512xf32> to vector<1x512xf32>
    %50 = vector.broadcast %48 : vector<3x1xf32> to vector<3x512xf32>
    %51 = vector.broadcast %49 : vector<1x512xf32> to vector<3x512xf32>
    %52 = arith.mulf %50, %51 : vector<3x512xf32>
    %53 = arith.addf %47, %52 : vector<3x512xf32>
    %cst_4 = arith.constant 0.000000e+00 : f32
    %54 = vector.broadcast %cst_4 : f32 to vector<3x512xf32>
    %55 = arith.maximumf %53, %54 : vector<3x512xf32>
    %56 = vector.extract_strided_slice %1 {offsets = [2, 0, 0], sizes = [1, 6, 3], strides = [1, 1, 1]} : vector<4x8x8xf32> to vector<1x6x3xf32>
    %57 = vector.shape_cast %56 : vector<1x6x3xf32> to vector<6x3xf32>
    %58 = vector.extract_strided_slice %57 {offsets = [0, 0], sizes = [6, 1], strides = [1, 1]} : vector<6x3xf32> to vector<6x1xf32>
    %59 = vector.extract_strided_slice %55 {offsets = [0, 0], sizes = [1, 512], strides = [1, 1]} : vector<3x512xf32> to vector<1x512xf32>
    %60 = vector.broadcast %58 : vector<6x1xf32> to vector<6x512xf32>
    %61 = vector.broadcast %59 : vector<1x512xf32> to vector<6x512xf32>
    %62 = arith.mulf %60, %61 : vector<6x512xf32>
    %63 = vector.extract_strided_slice %57 {offsets = [0, 1], sizes = [6, 1], strides = [1, 1]} : vector<6x3xf32> to vector<6x1xf32>
    %64 = vector.extract_strided_slice %55 {offsets = [1, 0], sizes = [1, 512], strides = [1, 1]} : vector<3x512xf32> to vector<1x512xf32>
    %65 = vector.broadcast %63 : vector<6x1xf32> to vector<6x512xf32>
    %66 = vector.broadcast %64 : vector<1x512xf32> to vector<6x512xf32>
    %67 = arith.mulf %65, %66 : vector<6x512xf32>
    %68 = arith.addf %62, %67 : vector<6x512xf32>
    %69 = vector.extract_strided_slice %57 {offsets = [0, 2], sizes = [6, 1], strides = [1, 1]} : vector<6x3xf32> to vector<6x1xf32>
    %70 = vector.extract_strided_slice %55 {offsets = [2, 0], sizes = [1, 512], strides = [1, 1]} : vector<3x512xf32> to vector<1x512xf32>
    %71 = vector.broadcast %69 : vector<6x1xf32> to vector<6x512xf32>
    %72 = vector.broadcast %70 : vector<1x512xf32> to vector<6x512xf32>
    %73 = arith.mulf %71, %72 : vector<6x512xf32>
    %74 = arith.addf %68, %73 : vector<6x512xf32>
    %cst_5 = arith.constant 0.000000e+00 : f32
    %75 = vector.broadcast %cst_5 : f32 to vector<6x512xf32>
    %76 = arith.maximumf %74, %75 : vector<6x512xf32>
    %77 = vector.extract_strided_slice %1 {offsets = [3, 0, 0], sizes = [1, 2, 6], strides = [1, 1, 1]} : vector<4x8x8xf32> to vector<1x2x6xf32>
    %78 = vector.shape_cast %77 : vector<1x2x6xf32> to vector<2x6xf32>
    %79 = vector.extract_strided_slice %78 {offsets = [0, 0], sizes = [2, 1], strides = [1, 1]} : vector<2x6xf32> to vector<2x1xf32>
    %80 = vector.extract_strided_slice %76 {offsets = [0, 0], sizes = [1, 512], strides = [1, 1]} : vector<6x512xf32> to vector<1x512xf32>
    %81 = vector.broadcast %79 : vector<2x1xf32> to vector<2x512xf32>
    %82 = vector.broadcast %80 : vector<1x512xf32> to vector<2x512xf32>
    %83 = arith.mulf %81, %82 : vector<2x512xf32>
    %84 = vector.extract_strided_slice %78 {offsets = [0, 1], sizes = [2, 1], strides = [1, 1]} : vector<2x6xf32> to vector<2x1xf32>
    %85 = vector.extract_strided_slice %76 {offsets = [1, 0], sizes = [1, 512], strides = [1, 1]} : vector<6x512xf32> to vector<1x512xf32>
    %86 = vector.broadcast %84 : vector<2x1xf32> to vector<2x512xf32>
    %87 = vector.broadcast %85 : vector<1x512xf32> to vector<2x512xf32>
    %88 = arith.mulf %86, %87 : vector<2x512xf32>
    %89 = arith.addf %83, %88 : vector<2x512xf32>
    %90 = vector.extract_strided_slice %78 {offsets = [0, 2], sizes = [2, 1], strides = [1, 1]} : vector<2x6xf32> to vector<2x1xf32>
    %91 = vector.extract_strided_slice %76 {offsets = [2, 0], sizes = [1, 512], strides = [1, 1]} : vector<6x512xf32> to vector<1x512xf32>
    %92 = vector.broadcast %90 : vector<2x1xf32> to vector<2x512xf32>
    %93 = vector.broadcast %91 : vector<1x512xf32> to vector<2x512xf32>
    %94 = arith.mulf %92, %93 : vector<2x512xf32>
    %95 = arith.addf %89, %94 : vector<2x512xf32>
    %96 = vector.extract_strided_slice %78 {offsets = [0, 3], sizes = [2, 1], strides = [1, 1]} : vector<2x6xf32> to vector<2x1xf32>
    %97 = vector.extract_strided_slice %76 {offsets = [3, 0], sizes = [1, 512], strides = [1, 1]} : vector<6x512xf32> to vector<1x512xf32>
    %98 = vector.broadcast %96 : vector<2x1xf32> to vector<2x512xf32>
    %99 = vector.broadcast %97 : vector<1x512xf32> to vector<2x512xf32>
    %100 = arith.mulf %98, %99 : vector<2x512xf32>
    %101 = arith.addf %95, %100 : vector<2x512xf32>
    %102 = vector.extract_strided_slice %78 {offsets = [0, 4], sizes = [2, 1], strides = [1, 1]} : vector<2x6xf32> to vector<2x1xf32>
    %103 = vector.extract_strided_slice %76 {offsets = [4, 0], sizes = [1, 512], strides = [1, 1]} : vector<6x512xf32> to vector<1x512xf32>
    %104 = vector.broadcast %102 : vector<2x1xf32> to vector<2x512xf32>
    %105 = vector.broadcast %103 : vector<1x512xf32> to vector<2x512xf32>
    %106 = arith.mulf %104, %105 : vector<2x512xf32>
    %107 = arith.addf %101, %106 : vector<2x512xf32>
    %108 = vector.extract_strided_slice %78 {offsets = [0, 5], sizes = [2, 1], strides = [1, 1]} : vector<2x6xf32> to vector<2x1xf32>
    %109 = vector.extract_strided_slice %76 {offsets = [5, 0], sizes = [1, 512], strides = [1, 1]} : vector<6x512xf32> to vector<1x512xf32>
    %110 = vector.broadcast %108 : vector<2x1xf32> to vector<2x512xf32>
    %111 = vector.broadcast %109 : vector<1x512xf32> to vector<2x512xf32>
    %112 = arith.mulf %110, %111 : vector<2x512xf32>
    %113 = arith.addf %107, %112 : vector<2x512xf32>
    %c0_6 = arith.constant 0 : index
    %c0_7 = arith.constant 0 : index
    %114 = vector.load %arg3[%c0_6, %c0_7] : memref<2x512xf32, #tpu.memory_space<vmem>>, vector<2x512xf32>
    tpu.vector_store %arg3[%c0_6, %c0_7], %113 {strides = array<i32>} : memref<2x512xf32, #tpu.memory_space<vmem>>, vector<2x512xf32>,
    return
  }
  func.func @transform_0(%arg0: i32) -> (i32, i32) {
    %c0_i32 = arith.constant 0 : i32
    %c0_i32_0 = arith.constant 0 : i32
    return %c0_i32, %arg0 : i32, i32
  }
  func.func @transform_1(%arg0: i32) -> (i32, i32, i32) {
    %c0_i32 = arith.constant 0 : i32
    %c0_i32_0 = arith.constant 0 : i32
    %c0_i32_1 = arith.constant 0 : i32
    %c0_i32_2 = arith.constant 0 : i32
    return %c0_i32, %c0_i32_0, %c0_i32_1 : i32, i32, i32
  }
  func.func @transform_2(%arg0: i32) -> (i32, i32) {
    %c0_i32 = arith.constant 0 : i32
    %c0_i32_0 = arith.constant 0 : i32
    return %c0_i32, %arg0 : i32, i32
  }
}

</mosaic_0001>

<bundles_post_ra>
// kernel: simplenet_forward.1
= control target key start
LH: loop header
LB: loop body
LE: loop exit
PB: predicated region body
PF: predicated region fallthrough
CT: control target
= control target key end

     0   :  { %7 = vsyncpa [#allocation3], 0  ;;  %s645_s9 = smov [#allocation2]   ;;  %s817_s0 = inlined_call_operand.vmem [shape: f32[3,512], index: 0, kind: input, shape index: {}]   ;;  %s818_s1 = inlined_call_operand.hbm [shape: f32[4,8,8], index: 1, kind: input, shape index: {}]   ;;  %s819_s2 = inlined_call_operand.vmem [shape: f32[2,512], index: 2, kind: output, shape index: {}]  }
   0x1   :  { %s15_s10 = sshll.u32 %s645_s9, 4  ;;  %s16_s10 = int_to_ptr.vmem [resolvable:$true] %s15_s10 }
   0x2   :  { %s631_s11 = scalar_lea.vmem %s16_s10, 512  ;;  %p636_p1 = scmp.lt.s32.totalorder %s16_s10, %s16_s10 }
   0x3   :  { %p632_p0 = scmp.ne.s32.totalorder %s16_s10, %s631_s11  ;;  %p637_p2 = scmp.lt.s32.totalorder %s631_s11, %s631_s11 }
   0x5   :  { %p638_p3 = por %p637_p2, %p636_p1 }
   0x7   :  { %p639_p4 = pnand %p638_p3, %p632_p0 }
   0x9   :  { %642 = shalt.err (!%p639_p4)
}
   0xa   :  { %s646_s12 = smov 128   ;;  %s647_s13 = smov 8  }
   0xb   :  { %21 = dma.hbm_to_vmem [thread:$0]  %s818_s1, 512, %s16_s10, [#allocation3], %s646_s12, %s646_s12, %s647_s13  }
   0xc   :  { %643 = dma.done.wait [#allocation3], 512  }
   0xd   :  { %644 = vsyncadd [#allocation3], 4294966784  ;;  %v648_v0 = vmov 2   ;;  %v649_v1 = vmov 0   ;;  %v27_v2 = vld [vmem:[#allocation2] sm:$0xff]  ;;  %v28_v3 = vld [vmem:[#allocation2 + $0x8] sm:$0xff]  ;;  %v38_v10 = vlaneseq }
   0xe   :  { %609 = vset.pattern.permute.xlu1 %v648_v0  ;;  %607 = vset.pattern.permute.xlu0 %v649_v1  ;;  %v650_v4 = vmov 1   ;;  %v29_v5 = vld [vmem:[#allocation2 + $0x10] sm:$0xff]  ;;  %v651_v6 = vmov 3   ;;  %v30_v7 = vld [vmem:[#allocation2 + $0x18] sm:$0xff]  ;;  %v652_v8 = vmov 4   ;;  %v653_v9 = vmov 5  }
   0xf   :  { %127 = vperm.xlu1 %609, %v27_v2   ;;  %33 = vperm.xlu0 %607, %v27_v2   ;;  %v673_v11 = vshrl.u32 %v38_v10, 7  ;;  %v25_v14 = vld [vmem:[%s817_s0] sm:$0x77]  ;;  %v26_v15 = vld [vmem:[%s817_s0 + $0x8] sm:$0x77] }
  0x11   :  { %v676_v12 = vsub.s32 0, %v673_v11  ;;  %v679_v13 = vsub.s32 4, %v673_v11  ;;  %v688_v16 = vsub.s32 1, %v673_v11  ;;  %v691_v17 = vsub.s32 5, %v673_v11 }
  0x12   :  { %v694_v18 = vsub.s32 2, %v673_v11  ;;  %v136_v19 = vsub.s32 6, %v673_v11 }
  0x13   :  { %610 = vset.pattern.permute.xlu1 %v649_v1  ;;  %608 = vset.pattern.permute.xlu0 %v650_v4  ;;  %v41_v20 = vrot.slane %v25_v14, %v676_v12  ;;  %v45_v21 = vrot.slane %v25_v14, %v679_v13  ;;  %v49_v22 = vrot.slane %v26_v15, %v676_v12 }
  0x14   :  { %180 = vperm.xlu1 %610, %v28_v3   ;;  %79 = vperm.xlu0 %608, %v27_v2   ;;  %v53_v23 = vrot.slane %v26_v15, %v679_v13  ;;  %v85_v24 = vrot.slane %v25_v14, %v688_v16  ;;  %v89_v25 = vrot.slane %v25_v14, %v691_v17 }
  0x15   :  { %v93_v26 = vrot.slane %v26_v15, %v688_v16  ;;  %v97_v27 = vrot.slane %v26_v15, %v691_v17  ;;  %v133_v28 = vrot.slane %v25_v14, %v694_v18  ;;  %v137_v29 = vrot.slane %v25_v14, %v136_v19 }
  0x16   :  { %v141_v30 = vrot.slane %v26_v15, %v694_v18  ;;  %v145_v31 = vrot.slane %v26_v15, %v136_v19  ;;  %v61_v34 = vrot.slane %v41_v20, %v676_v12  ;;  %v65_v35 = vrot.slane %v45_v21, %v676_v12 }
  0x17   :  { %v69_v36 = vrot.slane %v49_v22, %v676_v12  ;;  %v73_v37 = vrot.slane %v53_v23, %v676_v12  ;;  %v105_v38 = vrot.slane %v85_v24, %v688_v16  ;;  %v109_v39 = vrot.slane %v89_v25, %v688_v16 }
  0x18   :  { %611 = vset.pattern.permute.xlu1 %v650_v4  ;;  %612 = vset.pattern.permute.xlu0 %v648_v0  ;;  %v113_v40 = vrot.slane %v93_v26, %v688_v16  ;;  %v117_v41 = vrot.slane %v97_v27, %v688_v16  ;;  %v153_v42 = vrot.slane %v133_v28, %v694_v18 }
  0x19   :  { %204 = vperm.xlu1 %611, %v28_v3   ;;  %232 = vperm.xlu0 %612, %v28_v3   ;;  %v157_v43 = vrot.slane %v137_v29, %v694_v18  ;;  %v161_v44 = vrot.slane %v141_v30, %v694_v18  ;;  %v165_v45 = vrot.slane %v145_v31, %v694_v18 }
  0x1d   :  { %613 = vset.pattern.permute.xlu1 %v651_v6  ;;  %615 = vset.pattern.permute.xlu0 %v649_v1 }
  0x1e   :  { %260 = vperm.xlu1 %613, %v28_v3   ;;  %321 = vperm.xlu0 %615, %v29_v5  }
  0x22   :  { %614 = vset.pattern.permute.xlu1 %v652_v8  ;;  %406 = vperm.xlu0 %615, %v30_v7  }
  0x23   :  { %288 = vperm.xlu1 %614, %v28_v3  }
  0x26   :  { %619 = vset.pattern.permute.xlu0 %v648_v0 }
  0x27   :  { %616 = vset.pattern.permute.xlu1 %v650_v4  ;;  %458 = vperm.xlu0 %619, %v30_v7  }
  0x28   :  { %345 = vperm.xlu1 %616, %v29_v5  }
  0x2b   :  { %622 = vset.pattern.permute.xlu0 %v653_v9  ;;  %v720_v9 = vsub.s32 3, %v673_v11 }
  0x2c   :  { %617 = vset.pattern.permute.xlu1 %v648_v0  ;;  %542 = vperm.xlu0 %622, %v30_v7  }
  0x2d   :  { %373 = vperm.xlu1 %617, %v29_v5  }
  0x31   :  { %618 = vset.pattern.permute.xlu1 %v650_v4 }
  0x32   :  { %430 = vperm.xlu1 %618, %v30_v7  }
  0x36   :  { %620 = vset.pattern.permute.xlu1 %v651_v6 }
  0x37   :  { %486 = vperm.xlu1 %620, %v30_v7  }
  0x3b   :  { %621 = vset.pattern.permute.xlu1 %v652_v8 }
  0x3c   :  { %514 = vperm.xlu1 %621, %v30_v7  }
  0x8a   :  { %v128_v32 = vpop.permute.xlu1 %127  ;;  %v34_v33 = vpop.permute.xlu0 %33 }
  0x8b   :  { %v74_v46 = vmul.f32 %v61_v34, %v34_v33  ;;  %v75_v47 = vmul.f32 %v65_v35, %v34_v33  ;;  %v76_v48 = vmul.f32 %v69_v36, %v34_v33  ;;  %v77_v49 = vmul.f32 %v73_v37, %v34_v33 }
  0x8c   :  { %v166_v56 = vmul.f32 %v153_v42, %v128_v32  ;;  %v167_v57 = vmul.f32 %v157_v43, %v128_v32  ;;  %v168_v58 = vmul.f32 %v161_v44, %v128_v32  ;;  %v169_v59 = vmul.f32 %v165_v45, %v128_v32 }
  0x8f   :  { %v181_v50 = vpop.permute.xlu1 %180  ;;  %v80_v51 = vpop.permute.xlu0 %79 }
  0x90   :  { %v118_v52 = vmul.f32 %v105_v38, %v80_v51  ;;  %v119_v53 = vmul.f32 %v109_v39, %v80_v51  ;;  %v120_v54 = vmul.f32 %v113_v40, %v80_v51  ;;  %v121_v55 = vmul.f32 %v117_v41, %v80_v51 }
  0x92   :  { %v122_v60 = vadd.f32 %v118_v52, %v74_v46  ;;  %v123_v61 = vadd.f32 %v119_v53, %v75_v47  ;;  %v124_v62 = vadd.f32 %v120_v54, %v76_v48  ;;  %v125_v63 = vadd.f32 %v121_v55, %v77_v49 }
  0x94   :  { %v170_v0 = vadd.f32 %v166_v56, %v122_v60  ;;  %v171_v1 = vadd.f32 %v167_v57, %v123_v61  ;;  %v172_v2 = vadd.f32 %v168_v58, %v124_v62  ;;  %v173_v3 = vadd.f32 %v169_v59, %v125_v63  ;;  %v205_v4 = vpop.permute.xlu1 %204  ;;  %v233_v45 = vpop.permute.xlu0 %232 }
  0x96   :  { %v174_v5 = vmax.f32 %v170_v0, 0.0  ;;  %v175_v6 = vmax.f32 %v171_v1, 0.0  ;;  %v176_v7 = vmax.f32 %v172_v2, 0.0  ;;  %v177_v8 = vmax.f32 %v173_v3, 0.0 }
  0x98   :  { %v186_v10 = vrot.slane %v174_v5, %v676_v12  ;;  %v190_v14 = vrot.slane %v175_v6, %v676_v12  ;;  %v194_v15 = vrot.slane %v176_v7, %v676_v12  ;;  %v198_v19 = vrot.slane %v177_v8, %v676_v12 }
  0x99   :  { %v210_v20 = vrot.slane %v174_v5, %v688_v16  ;;  %v214_v21 = vrot.slane %v175_v6, %v688_v16  ;;  %v218_v22 = vrot.slane %v176_v7, %v688_v16  ;;  %v222_v23 = vrot.slane %v177_v8, %v688_v16  ;;  %v261_v24 = vpop.permute.xlu1 %260 }
  0x9a   :  { %v199_v25 = vmul.f32 %v186_v10, %v181_v50  ;;  %v200_v26 = vmul.f32 %v190_v14, %v181_v50  ;;  %v201_v27 = vmul.f32 %v194_v15, %v181_v50  ;;  %v202_v28 = vmul.f32 %v198_v19, %v181_v50 }
  0x9b   :  { %v223_v29 = vmul.f32 %v210_v20, %v205_v4  ;;  %v224_v30 = vmul.f32 %v214_v21, %v205_v4  ;;  %v225_v31 = vmul.f32 %v218_v22, %v205_v4  ;;  %v226_v32 = vmul.f32 %v222_v23, %v205_v4 }
  0x9c   :  { %v266_v33 = vrot.slane %v174_v5, %v720_v9  ;;  %v270_v34 = vrot.slane %v175_v6, %v720_v9  ;;  %v274_v35 = vrot.slane %v176_v7, %v720_v9  ;;  %v278_v36 = vrot.slane %v177_v8, %v720_v9 }
  0x9d   :  { %v227_v37 = vadd.f32 %v223_v29, %v199_v25  ;;  %v228_v38 = vadd.f32 %v224_v30, %v200_v26  ;;  %v229_v39 = vadd.f32 %v225_v31, %v201_v27  ;;  %v230_v40 = vadd.f32 %v226_v32, %v202_v28 }
  0x9e   :  { %v279_v41 = vmul.f32 %v266_v33, %v261_v24  ;;  %v280_v42 = vmul.f32 %v270_v34, %v261_v24  ;;  %v281_v43 = vmul.f32 %v274_v35, %v261_v24  ;;  %v282_v44 = vmul.f32 %v278_v36, %v261_v24  ;;  %v289_v50 = vpop.permute.xlu1 %288  ;;  %v322_v35 = vpop.permute.xlu0 %321 }
  0x9f   :  { %v238_v46 = vrot.slane %v174_v5, %v694_v18  ;;  %v242_v47 = vrot.slane %v175_v6, %v694_v18  ;;  %v246_v48 = vrot.slane %v176_v7, %v694_v18  ;;  %v250_v49 = vrot.slane %v177_v8, %v694_v18 }
  0xa0   :  { %v294_v51 = vrot.slane %v174_v5, %v679_v13  ;;  %v298_v52 = vrot.slane %v175_v6, %v679_v13  ;;  %v302_v53 = vrot.slane %v176_v7, %v679_v13  ;;  %v306_v54 = vrot.slane %v177_v8, %v679_v13 }
  0xa1   :  { %v251_v55 = vmul.f32 %v238_v46, %v233_v45  ;;  %v252_v56 = vmul.f32 %v242_v47, %v233_v45  ;;  %v253_v57 = vmul.f32 %v246_v48, %v233_v45  ;;  %v254_v58 = vmul.f32 %v250_v49, %v233_v45 }
  0xa2   :  { %v307_v59 = vmul.f32 %v294_v51, %v289_v50  ;;  %v308_v60 = vmul.f32 %v298_v52, %v289_v50  ;;  %v309_v61 = vmul.f32 %v302_v53, %v289_v50  ;;  %v310_v62 = vmul.f32 %v306_v54, %v289_v50 }
  0xa3   :  { %v255_v63 = vadd.f32 %v251_v55, %v227_v37  ;;  %v256_v0 = vadd.f32 %v252_v56, %v228_v38  ;;  %v257_v1 = vadd.f32 %v253_v57, %v229_v39  ;;  %v258_v2 = vadd.f32 %v254_v58, %v230_v40  ;;  %v346_v15 = vpop.permute.xlu1 %345 }
  0xa5   :  { %v283_v3 = vadd.f32 %v279_v41, %v255_v63  ;;  %v284_v4 = vadd.f32 %v280_v42, %v256_v0  ;;  %v285_v5 = vadd.f32 %v281_v43, %v257_v1  ;;  %v286_v6 = vadd.f32 %v282_v44, %v258_v2 }
  0xa7   :  { %v311_v10 = vadd.f32 %v307_v59, %v283_v3  ;;  %v312_v7 = vadd.f32 %v308_v60, %v284_v4  ;;  %v313_v14 = vadd.f32 %v309_v61, %v285_v5  ;;  %v314_v8 = vadd.f32 %v310_v62, %v286_v6  ;;  %v407_v4 = vpop.permute.xlu0 %406 }
  0xa8   :  { %v374_v40 = vpop.permute.xlu1 %373  ;;  %v654_v62 = vmov 1983009808  }
  0xa9   :  { %v315_v19 = vmax.f32 %v311_v10, 0.0  ;;  %v316_v20 = vmax.f32 %v312_v7, 0.0  ;;  %v317_v21 = vmax.f32 %v313_v14, 0.0  ;;  %v318_v22 = vmax.f32 %v314_v8, 0.0 }
  0xaa   :  { %v762_v63 = vunpack.c.l.s4 %v654_v62 }
  0xab   :  { %v351_v23 = vrot.slane %v315_v19, %v688_v16  ;;  %v355_v24 = vrot.slane %v316_v20, %v688_v16  ;;  %v359_v25 = vrot.slane %v317_v21, %v688_v16  ;;  %v363_v26 = vrot.slane %v318_v22, %v688_v16 }
  0xac   :  { %v327_v27 = vrot.slane %v315_v19, %v676_v12  ;;  %v331_v28 = vrot.slane %v316_v20, %v676_v12  ;;  %v335_v29 = vrot.slane %v317_v21, %v676_v12  ;;  %v339_v30 = vrot.slane %v318_v22, %v676_v12 }
  0xad   :  { %v364_v31 = vmul.f32 %v351_v23, %v346_v15  ;;  %v365_v32 = vmul.f32 %v355_v24, %v346_v15  ;;  %v366_v33 = vmul.f32 %v359_v25, %v346_v15  ;;  %v367_v34 = vmul.f32 %v363_v26, %v346_v15  ;;  %v431_v61 = vpop.permute.xlu1 %430 }
  0xae   :  { %v340_v36 = vmul.f32 %v327_v27, %v322_v35  ;;  %v341_v37 = vmul.f32 %v331_v28, %v322_v35  ;;  %v342_v38 = vmul.f32 %v335_v29, %v322_v35  ;;  %v343_v39 = vmul.f32 %v339_v30, %v322_v35 }
  0xaf   :  { %v379_v41 = vrot.slane %v315_v19, %v694_v18  ;;  %v383_v42 = vrot.slane %v316_v20, %v694_v18  ;;  %v387_v43 = vrot.slane %v317_v21, %v694_v18  ;;  %v391_v44 = vrot.slane %v318_v22, %v694_v18 }
  0xb0   :  { %v368_v45 = vadd.f32 %v364_v31, %v340_v36  ;;  %v369_v46 = vadd.f32 %v365_v32, %v341_v37  ;;  %v370_v47 = vadd.f32 %v366_v33, %v342_v38  ;;  %v371_v48 = vadd.f32 %v367_v34, %v343_v39  ;;  %v459_v31 = vpop.permute.xlu0 %458 }
  0xb1   :  { %v392_v49 = vmul.f32 %v379_v41, %v374_v40  ;;  %v393_v50 = vmul.f32 %v383_v42, %v374_v40  ;;  %v394_v51 = vmul.f32 %v387_v43, %v374_v40  ;;  %v395_v52 = vmul.f32 %v391_v44, %v374_v40 }
  0xb2   :  { %v487_v26 = vpop.permute.xlu1 %486  ;;  %v577_v32 = vunpack.c.0.s8 %v762_v63 }
  0xb3   :  { %v396_v53 = vadd.f32 %v392_v49, %v368_v45  ;;  %v397_v54 = vadd.f32 %v393_v50, %v369_v46  ;;  %v398_v55 = vadd.f32 %v394_v51, %v370_v47  ;;  %v399_v56 = vadd.f32 %v395_v52, %v371_v48 }
  0xb4   :  { %v543_v52 = vpop.permute.xlu0 %542 }
  0xb5   :  { %v754_v57 = vmax.f32 %v396_v53, 0.0  ;;  %v756_v58 = vmax.f32 %v397_v54, 0.0  ;;  %v758_v59 = vmax.f32 %v398_v55, 0.0  ;;  %v760_v60 = vmax.f32 %v399_v56, 0.0 }
  0xb7   :  { %v412_v0 = vrot.slane %v754_v57, %v676_v12  ;;  %v416_v1 = vrot.slane %v756_v58, %v676_v12  ;;  %v420_v2 = vrot.slane %v758_v59, %v676_v12  ;;  %v424_v3 = vrot.slane %v760_v60, %v676_v12  ;;  %v515_v48 = vpop.permute.xlu1 %514 }
  0xb8   :  { %v436_v5 = vrot.slane %v754_v57, %v688_v16  ;;  %v440_v6 = vrot.slane %v756_v58, %v688_v16  ;;  %v444_v10 = vrot.slane %v758_v59, %v688_v16  ;;  %v448_v7 = vrot.slane %v760_v60, %v688_v16 }
  0xb9   :  { %v425_v14 = vmul.f32 %v412_v0, %v407_v4  ;;  %v426_v8 = vmul.f32 %v416_v1, %v407_v4  ;;  %v427_v15 = vmul.f32 %v420_v2, %v407_v4  ;;  %v428_v19 = vmul.f32 %v424_v3, %v407_v4 }
  0xba   :  { %v449_v20 = vmul.f32 %v436_v5, %v431_v61  ;;  %v450_v21 = vmul.f32 %v440_v6, %v431_v61  ;;  %v451_v12 = vmul.f32 %v444_v10, %v431_v61  ;;  %v452_v22 = vmul.f32 %v448_v7, %v431_v61 }
  0xbb   :  { %v464_v23 = vrot.slane %v754_v57, %v694_v18  ;;  %v468_v24 = vrot.slane %v756_v58, %v694_v18  ;;  %v472_v25 = vrot.slane %v758_v59, %v694_v18  ;;  %v476_v16 = vrot.slane %v760_v60, %v694_v18 }
  0xbc   :  { %v453_v27 = vadd.f32 %v449_v20, %v425_v14  ;;  %v454_v28 = vadd.f32 %v450_v21, %v426_v8  ;;  %v455_v29 = vadd.f32 %v451_v12, %v427_v15  ;;  %v456_v30 = vadd.f32 %v452_v22, %v428_v19 }
  0xbd   :  { %v477_v33 = vmul.f32 %v464_v23, %v459_v31  ;;  %v478_v34 = vmul.f32 %v468_v24, %v459_v31  ;;  %v479_v35 = vmul.f32 %v472_v25, %v459_v31  ;;  %v480_v36 = vmul.f32 %v476_v16, %v459_v31 }
  0xbe   :  { %v548_v37 = vrot.slane %v754_v57, %v691_v17  ;;  %v552_v38 = vrot.slane %v756_v58, %v691_v17  ;;  %v556_v18 = vrot.slane %v758_v59, %v691_v17  ;;  %v560_v39 = vrot.slane %v760_v60, %v691_v17 }
  0xbf   :  { %v481_v40 = vadd.f32 %v477_v33, %v453_v27  ;;  %v482_v41 = vadd.f32 %v478_v34, %v454_v28  ;;  %v483_v42 = vadd.f32 %v479_v35, %v455_v29  ;;  %v484_v43 = vadd.f32 %v480_v36, %v456_v30 }
  0xc0   :  { %v492_v44 = vrot.slane %v754_v57, %v720_v9  ;;  %v496_v45 = vrot.slane %v756_v58, %v720_v9  ;;  %v500_v46 = vrot.slane %v758_v59, %v720_v9  ;;  %v504_v47 = vrot.slane %v760_v60, %v720_v9 }
  0xc1   :  { %v520_v17 = vrot.slane %v754_v57, %v679_v13  ;;  %v524_v49 = vrot.slane %v756_v58, %v679_v13  ;;  %v528_v50 = vrot.slane %v758_v59, %v679_v13  ;;  %v532_v51 = vrot.slane %v760_v60, %v679_v13 }
  0xc2   :  { %v505_v53 = vmul.f32 %v492_v44, %v487_v26  ;;  %v506_v54 = vmul.f32 %v496_v45, %v487_v26  ;;  %v507_v55 = vmul.f32 %v500_v46, %v487_v26  ;;  %v508_v56 = vmul.f32 %v504_v47, %v487_v26 }
  0xc3   :  { %v533_v61 = vmul.f32 %v520_v17, %v515_v48  ;;  %v534_v9 = vmul.f32 %v524_v49, %v515_v48  ;;  %v535_v62 = vmul.f32 %v528_v50, %v515_v48  ;;  %v536_v63 = vmul.f32 %v532_v51, %v515_v48 }
  0xc4   :  { %v509_v0 = vadd.f32 %v505_v53, %v481_v40  ;;  %v510_v57 = vadd.f32 %v506_v54, %v482_v41  ;;  %v511_v1 = vadd.f32 %v507_v55, %v483_v42  ;;  %v512_v2 = vadd.f32 %v508_v56, %v484_v43 }
  0xc5   :  { %v561_v58 = vmul.f32 %v548_v37, %v543_v52  ;;  %v562_v3 = vmul.f32 %v552_v38, %v543_v52  ;;  %v563_v4 = vmul.f32 %v556_v18, %v543_v52  ;;  %v564_v59 = vmul.f32 %v560_v39, %v543_v52 }
  0xc6   :  { %v537_v5 = vadd.f32 %v533_v61, %v509_v0  ;;  %v538_v6 = vadd.f32 %v534_v9, %v510_v57  ;;  %v539_v13 = vadd.f32 %v535_v62, %v511_v1  ;;  %v540_v60 = vadd.f32 %v536_v63, %v512_v2 }
  0xc7   :  { %v580_v10 = vsub.s32 %v577_v32, %v673_v11 }
  0xc8   :  { %v565_v7 = vadd.f32 %v561_v58, %v537_v5  ;;  %v566_v14 = vadd.f32 %v562_v3, %v538_v6  ;;  %v567_v8 = vadd.f32 %v563_v4, %v539_v13  ;;  %v568_v15 = vadd.f32 %v564_v59, %v540_v60 }
  0xca   :  { %v573_v19 = vcombine.low %v565_v7, %v566_v14  ;;  %v574_v20 = vcombine.low %v567_v8, %v568_v15 }
  0xcc   :  { %v581_v21 = vrot.slane %v573_v19, %v580_v10  ;;  %v588_v12 = vrot.slane %v574_v20, %v580_v10 }
  0xce   :  { %v589_v22 = vcombine.low %v581_v21, %v588_v12 }
  0xd0   :  { %591 = vst [vmem:[%s819_s2] sm:$0xff] %v589_v22 }
  0xd1   :  { %596 = vsyncpa [#allocation3], 1 }

</bundles_post_ra>
